<compile_context>
chip_gen: v5e
topology: v5e:2x2
jax: 0.10.0
libtpu: 0.0.40
codegen_flags: <defaults>
</compile_context>

<pallas_src>
import functools

import jax
import jax.numpy as jnp
from jax.experimental import pallas as pl
from jax.experimental.pallas import tpu as pltpu


def pinn_kernel(xt_ref, w1_ref, b1_ref, w2_ref, b2_ref, w3_ref, b3_ref, o_ref):
    # xt_ref: (2, TN)  batch in lanes, features in sublanes
    xt = xt_ref[...]
    x0 = xt[0:1, :]                       # (1, TN)
    x1 = xt[1:2, :]                       # (1, TN)

    # fc1 on the VPU: K=2 is far too small to feed the MXU; two broadcast
    # multiply-adds issue in otherwise-idle VALU slots.
    w1 = w1_ref[...]                      # (20, 2)
    h1 = jnp.tanh(w1[:, 0:1] * x0 + w1[:, 1:2] * x1 + b1_ref[...])      # (20, TN)

    # fc2 / fc3 on the MXU, f32 accumulation.
    h2 = jnp.tanh(
        jnp.dot(w2_ref[...], h1, preferred_element_type=jnp.float32) + b2_ref[...]
    )                                                                    # (20, TN)
    o_ref[...] = (
        jnp.dot(w3_ref[...], h2, preferred_element_type=jnp.float32) + b3_ref[...]
    )                                                                    # (1, TN)


@functools.partial(jax.jit, static_argnames=("tn",))
def pinn_forward(x, params, tn=512):
    """x: [N, 2] f32; params: PyTorch-convention weights W[out, in], b[out].

    tn: batch tile width in lanes (multiple of 128). N may be ragged; it is
    padded to a multiple of tn in the wrapper and sliced back afterwards.
    """
    n, d_in = x.shape
    assert d_in == 2
    assert tn % 128 == 0

    n_pad = pl.cdiv(n, tn) * tn

    # Feature-major input: (2, N_pad), batch in lanes.
    xt = jnp.transpose(x)
    if n_pad != n:
        xt = jnp.pad(xt, ((0, 0), (0, n_pad - n)))

    # Weights stay [out, in]; biases become column vectors that broadcast
    # along the lane (batch) axis inside the kernel.
    w1 = params["w1"]                    # (20, 2)
    w2 = params["w2"]                    # (20, 20)
    w3 = params["w3"]                    # (1, 20)
    b1 = params["b1"][:, None]           # (20, 1)
    b2 = params["b2"][:, None]           # (20, 1)
    b3 = params["b3"][:, None]           # (1, 1)

    grid = (n_pad // tn,)

    # Grid-invariant operands: whole array resident in VMEM, no per-step DMA,
    # no double-buffering.
    vmem_full = pl.BlockSpec(memory_space=pltpu.MemorySpace.VMEM)

    n_weight_bytes = 4 * (20 * 2 + 20 + 20 * 20 + 20 + 20 + 1)
    cost = pl.CostEstimate(
        flops=880 * n_pad,               # 2*(2*20 + 20*20 + 20*1) per point
        transcendentals=40 * n_pad,      # two tanh layers of width 20
        bytes_accessed=12 * n_pad + n_weight_bytes,  # 8 B in + 4 B out per point
    )

    out_t = pl.pallas_call(
        pinn_kernel,
        out_shape=jax.ShapeDtypeStruct((1, n_pad), jnp.float32),
        grid=grid,
        in_specs=[
            pl.BlockSpec((2, tn), lambda i: (0, i)),   # x tile: lane-dense batch
            vmem_full,  # w1
            vmem_full,  # b1
            vmem_full,  # w2
            vmem_full,  # b2
            vmem_full,  # w3
            vmem_full,  # b3
        ],
        out_specs=pl.BlockSpec((1, tn), lambda i: (0, i)),  # lane-dense output slab
        compiler_params=pltpu.CompilerParams(
            dimension_semantics=("parallel",),
        ),
        cost_estimate=cost,
    )(xt, w1, b1, w2, b2, w3, b3)

    # Back to PyTorch convention: [N, 1].
    return out_t[0, :n][:, None]


def init_params(key):
    """Deterministic init mimicking nn.Linear default (uniform +-1/sqrt(fan_in))."""
    ks = jax.random.split(key, 6)

    def lin(kw, kb, fan_in, fan_out):
        bound = 1.0 / jnp.sqrt(jnp.float32(fan_in))
        w = jax.random.uniform(kw, (fan_out, fan_in), jnp.float32, -bound, bound)
        b = jax.random.uniform(kb, (fan_out,), jnp.float32, -bound, bound)
        return w, b

    w1, b1 = lin(ks[0], ks[1], 2, 20)
    w2, b2 = lin(ks[2], ks[3], 20, 20)
    w3, b3 = lin(ks[4], ks[5], 20, 1)
    return {"w1": w1, "b1": b1, "w2": w2, "b2": b2, "w3": w3, "b3": b3}


def pinn_reference(x, p):
    h1 = jnp.tanh(x @ p["w1"].T + p["b1"])
    h2 = jnp.tanh(h1 @ p["w2"].T + p["b2"])
    return h2 @ p["w3"].T + p["b3"]


if __name__ == "__main__":
    key = jax.random.PRNGKey(0)
    kp, kx = jax.random.split(key)

    params = init_params(kp)

    # Collocation points (x, t) pairs; ragged N exercises the padding path and
    # gives a multi-step grid (cdiv(2000, 512) = 4 steps).
    N = 2000
    x = jax.random.uniform(kx, (N, 2), jnp.float32)

    out = pinn_forward(x, params, tn=512)
    out = jax.block_until_ready(out)

    ref = pinn_reference(x, params)
    assert out.shape == (N, 1)
    assert jnp.allclose(out, ref, atol=1e-4, rtol=1e-4)

    print("KERNEL_OK")
</pallas_src>

<mosaic_0001>
module attributes {stable_mosaic.version = 11 : i64} {
  func.func @pinn_kernel(%arg0: i32, %arg1: memref<2x512xf32, #tpu.memory_space<vmem>>, %arg2: memref<20x2xf32, #tpu.memory_space<vmem>>, %arg3: memref<20x1xf32, #tpu.memory_space<vmem>>, %arg4: memref<20x20xf32, #tpu.memory_space<vmem>>, %arg5: memref<20x1xf32, #tpu.memory_space<vmem>>, %arg6: memref<1x20xf32, #tpu.memory_space<vmem>>, %arg7: memref<1x1xf32, #tpu.memory_space<vmem>>, %arg8: memref<1x512xf32, #tpu.memory_space<vmem>>) attributes {dimension_semantics = [#tpu.dimension_semantics<parallel>], iteration_bounds = array<i64: 4>, scalar_prefetch = 0 : i64, scratch_operands = 0 : i64, tpu.core_type = #tpu.core_type<tc>, window_params = [{transform_indices = @transform_0, window_bounds = array<i64: 2, 512>}, {pipeline_mode = #tpu.pipeline_mode<synchronous>, transform_indices = @transform_1, window_bounds = array<i64: 20, 2>}, {pipeline_mode = #tpu.pipeline_mode<synchronous>, transform_indices = @transform_2, window_bounds = array<i64: 20, 1>}, {pipeline_mode = #tpu.pipeline_mode<synchronous>, transform_indices = @transform_3, window_bounds = array<i64: 20, 20>}, {pipeline_mode = #tpu.pipeline_mode<synchronous>, transform_indices = @transform_4, window_bounds = array<i64: 20, 1>}, {pipeline_mode = #tpu.pipeline_mode<synchronous>, transform_indices = @transform_5, window_bounds = array<i64: 1, 20>}, {pipeline_mode = #tpu.pipeline_mode<synchronous>, transform_indices = @transform_6, window_bounds = array<i64: 1, 1>}, {transform_indices = @transform_7, window_bounds = array<i64: 1, 512>}]} {
    %c0 = arith.constant 0 : index
    %c0_0 = arith.constant 0 : index
    %0 = vector.load %arg1[%c0, %c0_0] : memref<2x512xf32, #tpu.memory_space<vmem>>, vector<2x512xf32>
    %1 = vector.extract_strided_slice %0 {offsets = [0, 0], sizes = [1, 512], strides = [1, 1]} : vector<2x512xf32> to vector<1x512xf32>
    %2 = vector.extract_strided_slice %0 {offsets = [1, 0], sizes = [1, 512], strides = [1, 1]} : vector<2x512xf32> to vector<1x512xf32>
    %c0_1 = arith.constant 0 : index
    %c0_2 = arith.constant 0 : index
    %3 = vector.load %arg2[%c0_1, %c0_2] : memref<20x2xf32, #tpu.memory_space<vmem>>, vector<20x2xf32>
    %4 = vector.extract_strided_slice %3 {offsets = [0, 0], sizes = [20, 1], strides = [1, 1]} : vector<20x2xf32> to vector<20x1xf32>
    %5 = vector.broadcast %4 : vector<20x1xf32> to vector<20x512xf32>
    %6 = vector.broadcast %1 : vector<1x512xf32> to vector<20x512xf32>
    %7 = arith.mulf %5, %6 : vector<20x512xf32>
    %8 = vector.extract_strided_slice %3 {offsets = [0, 1], sizes = [20, 1], strides = [1, 1]} : vector<20x2xf32> to vector<20x1xf32>
    %9 = vector.broadcast %8 : vector<20x1xf32> to vector<20x512xf32>
    %10 = vector.broadcast %2 : vector<1x512xf32> to vector<20x512xf32>
    %11 = arith.mulf %9, %10 : vector<20x512xf32>
    %12 = arith.addf %7, %11 : vector<20x512xf32>
    %c0_3 = arith.constant 0 : index
    %c0_4 = arith.constant 0 : index
    %13 = vector.load %arg3[%c0_3, %c0_4] : memref<20x1xf32, #tpu.memory_space<vmem>>, vector<20x1xf32>
    %14 = vector.broadcast %13 : vector<20x1xf32> to vector<20x512xf32>
    %15 = arith.addf %12, %14 : vector<20x512xf32>
    %16 = math.tanh %15 : vector<20x512xf32>
    %c0_5 = arith.constant 0 : index
    %c0_6 = arith.constant 0 : index
    %17 = vector.load %arg4[%c0_5, %c0_6] : memref<20x20xf32, #tpu.memory_space<vmem>>, vector<20x20xf32>
    %cst = arith.constant dense<0.000000e+00> : vector<20x512xf32>
    %18 = tpu.matmul %17, %16, %cst {dimension_numbers = #tpu.dot_dimension_numbers<[1], [0], [0], [1], [0, 0, 1, 1], [], []>} : vector<20x20xf32>, vector<20x512xf32>, vector<20x512xf32> -> vector<20x512xf32>
    %c0_7 = arith.constant 0 : index
    %c0_8 = arith.constant 0 : index
    %19 = vector.load %arg5[%c0_7, %c0_8] : memref<20x1xf32, #tpu.memory_space<vmem>>, vector<20x1xf32>
    %20 = vector.broadcast %19 : vector<20x1xf32> to vector<20x512xf32>
    %21 = arith.addf %18, %20 : vector<20x512xf32>
    %22 = math.tanh %21 : vector<20x512xf32>
    %c0_9 = arith.constant 0 : index
    %c0_10 = arith.constant 0 : index
    %23 = vector.load %arg6[%c0_9, %c0_10] : memref<1x20xf32, #tpu.memory_space<vmem>>, vector<1x20xf32>
    %cst_11 = arith.constant dense<0.000000e+00> : vector<1x512xf32>
    %24 = tpu.matmul %23, %22, %cst_11 {dimension_numbers = #tpu.dot_dimension_numbers<[1], [0], [0], [1], [0, 0, 1, 1], [], []>} : vector<1x20xf32>, vector<20x512xf32>, vector<1x512xf32> -> vector<1x512xf32>
    %c0_12 = arith.constant 0 : index
    %c0_13 = arith.constant 0 : index
    %25 = vector.load %arg7[%c0_12, %c0_13] : memref<1x1xf32, #tpu.memory_space<vmem>>, vector<1x1xf32>
    %26 = vector.broadcast %25 : vector<1x1xf32> to vector<1x512xf32>
    %27 = arith.addf %24, %26 : vector<1x512xf32>
    %c0_14 = arith.constant 0 : index
    %c0_15 = arith.constant 0 : index
    %28 = vector.load %arg8[%c0_14, %c0_15] : memref<1x512xf32, #tpu.memory_space<vmem>>, vector<1x512xf32>
    tpu.vector_store %arg8[%c0_14, %c0_15], %27 {strides = array<i32>} : memref<1x512xf32, #tpu.memory_space<vmem>>, vector<1x512xf32>,
    return
  }
  func.func @transform_0(%arg0: i32) -> (i32, i32) {
    %c0_i32 = arith.constant 0 : i32
    %c0_i32_0 = arith.constant 0 : i32
    return %c0_i32, %arg0 : i32, i32
  }
  func.func @transform_1(%arg0: i32) -> (i32, i32) {
    %c0_i32 = arith.constant 0 : i32
    %c0_i32_0 = arith.constant 0 : i32
    %c0_i32_1 = arith.constant 0 : i32
    return %c0_i32, %c0_i32_0 : i32, i32
  }
  func.func @transform_2(%arg0: i32) -> (i32, i32) {
    %c0_i32 = arith.constant 0 : i32
    %c0_i32_0 = arith.constant 0 : i32
    %c0_i32_1 = arith.constant 0 : i32
    return %c0_i32, %c0_i32_0 : i32, i32
  }
  func.func @transform_3(%arg0: i32) -> (i32, i32) {
    %c0_i32 = arith.constant 0 : i32
    %c0_i32_0 = arith.constant 0 : i32
    %c0_i32_1 = arith.constant 0 : i32
    return %c0_i32, %c0_i32_0 : i32, i32
  }
  func.func @transform_4(%arg0: i32) -> (i32, i32) {
    %c0_i32 = arith.constant 0 : i32
    %c0_i32_0 = arith.constant 0 : i32
    %c0_i32_1 = arith.constant 0 : i32
    return %c0_i32, %c0_i32_0 : i32, i32
  }
  func.func @transform_5(%arg0: i32) -> (i32, i32) {
    %c0_i32 = arith.constant 0 : i32
    %c0_i32_0 = arith.constant 0 : i32
    %c0_i32_1 = arith.constant 0 : i32
    return %c0_i32, %c0_i32_0 : i32, i32
  }
  func.func @transform_6(%arg0: i32) -> (i32, i32) {
    %c0_i32 = arith.constant 0 : i32
    %c0_i32_0 = arith.constant 0 : i32
    %c0_i32_1 = arith.constant 0 : i32
    return %c0_i32, %c0_i32_0 : i32, i32
  }
  func.func @transform_7(%arg0: i32) -> (i32, i32) {
    %c0_i32 = arith.constant 0 : i32
    %c0_i32_0 = arith.constant 0 : i32
    return %c0_i32, %arg0 : i32, i32
  }
}

</mosaic_0001>

<bundles_post_ra>
// kernel: pinn_forward.1
= control target key start
LH: loop header
LB: loop body
LE: loop exit
PB: predicated region body
PF: predicated region fallthrough
CT: control target
= control target key end

     0   :  { %s901_s26 = smov 0   ;;  %s987_s0 = inlined_call_operand.vmem [shape: f32[2,2048], index: 0, kind: input, shape index: {}]   ;;  %s988_s1 = inlined_call_operand.vmem [shape: f32[20,2], index: 1, kind: input, shape index: {}]   ;;  %s989_s2 = inlined_call_operand.vmem [shape: f32[20,1], index: 2, kind: input, shape index: {}]   ;;  %s990_s3 = inlined_call_operand.vmem [shape: f32[20,20], index: 3, kind: input, shape index: {}]   ;;  %s991_s4 = inlined_call_operand.vmem [shape: f32[20,1], index: 4, kind: input, shape index: {}]   ;;  %s992_s5 = inlined_call_operand.vmem [shape: f32[1,20], index: 5, kind: input, shape index: {}]   ;;  %s993_s6 = inlined_call_operand.<no memory space> [shape: f32[1,1], index: 6, kind: input, shape index: {}]   ;;  %s994_s7 = inlined_call_operand.vmem [shape: f32[1,2048], index: 7, kind: output, shape index: {}]  }
   0x1   :  { %v12_v0 = vstv %s993_s6 }
   0x2   :  { %13 = vst [vmem:[#allocation2] sm:$0x1] %v12_v0 }
   0x3 LB: > { %s748_s27 = sadd.s32 4294967295, %s854_s26   ;;  %p752_p0 = scmp.ge.s32.totalorder %s854_s26, 1  ;;  %s854_s26 = sphi %s901_s26, %s19_s26  }
   0x4   : > { %p240_p1 = scmp.lt.s32.totalorder %s854_s26, 5 }
   0x6   : > { %p241_p2 = pnand %p752_p0, %p240_p1 }
   0x7   : > { %s753_s22 = sshll.u32 (!%p241_p2), %s748_s27, 2 }
   0x8   : > { %244 = sbr.rel (%p241_p2) target bundleno = 468 (0x1d4), region = 48  ;;  %p272_p3 = scmp.lt.s32.totalorder (!%p241_p2), %s753_s22, 15 }
   0xd   : > { %v285_v1 = vld [vmem:[%s988_s1 + $0x10] sm:$0xf]  ;;  %v284_v2 = vld [vmem:[%s988_s1 + $0x8] sm:$0xff]  ;;  %v856_v3 = vmov 1   ;;  %v857_v4 = vmov 0   ;;  %v283_v5 = vld [vmem:[%s988_s1] sm:$0xff] }
   0xe   : > { %792 = vset.pattern.permute.xlu0 %v856_v3  ;;  %794 = vset.pattern.permute.xlu1 %v857_v4  ;;  %v374_v6 = vld [vmem:[%s989_s2] sm:$0xff]  ;;  %v376_v7 = vld [vmem:[%s989_s2 + $0x10] sm:$0xf]  ;;  %v375_v8 = vld [vmem:[%s989_s2 + $0x8] sm:$0xff]  ;;  %s996_s22 = smov (!%p272_p3, %s753_s22), 15  ;;  %vm447_vm0 = vcmask 1043456  }
   0xf   : > { %335 = vperm.xlu0 %792, %v285_v1   ;;  %293 = vperm.xlu1 %794, %v284_v2   ;;  %v421_v9 = vld [vmem:[%s991_s4 + $0x10] sm:$0xf]  ;;  %v420_v10 = vld [vmem:[%s991_s4 + $0x8] sm:$0xff]  ;;  %v419_v11 = vld [vmem:[%s991_s4] sm:$0xff]  ;;  %s754_s23 = sshll.u32 %s996_s22, 1  ;;  %vm437_vm1 = vcmask 162816   ;;  %s280_s14 = scalar_lea.vmem %s994_s7, %s996_s22 }
  0x10   : > { %796 = vset.pattern.permute.xlu2 %v857_v4  ;;  %v577_v12 = vld [vmem:[#allocation2] sm:$0x1]  ;;  %s275_s28 = scalar_lea.vmem %s987_s0, %s754_s23  ;;  %vm686_vm2 = vcmask 1040384   ;;  %vm688_vm3 = vcmask 1042434   ;;  %vm690_vm4 = vcmask 1041408  }
  0x11   : > { %288 = vperm.xlu2 %796, %v283_v5   ;;  %v282_v14 = vld [vmem:[%s275_s28] sm:$0xff] }
  0x12   : > { %v302_v17 = vperm.slane %v282_v14, 0  ;;  %v338_v18 = vperm.slane %v282_v14, 1  ;;  %v339_v19 = vperm.slane %v282_v14, 3  ;;  %v303_v20 = vperm.slane %v282_v14, 2 }
  0x13   : > { %v340_v22 = vperm.slane %v282_v14, 5  ;;  %v304_v26 = vperm.slane %v282_v14, 4  ;;  %v305_v27 = vperm.slane %v282_v14, 6  ;;  %v341_v33 = vperm.slane %v282_v14, 7 }
  0x14   : > { %v310_v23 = vperm.slane %v302_v17, 0  ;;  %v346_v24 = vperm.slane %v338_v18, 1  ;;  %v347_v25 = vperm.slane %v339_v19, 1  ;;  %v311_v28 = vperm.slane %v303_v20, 0 }
  0x15   : > { %v348_v34 = vperm.slane %v340_v22, 1  ;;  %v312_v39 = vperm.slane %v304_v26, 0  ;;  %v313_v40 = vperm.slane %v305_v27, 0  ;;  %v349_v44 = vperm.slane %v341_v33, 1 }
  0x17   : > { %793 = vset.pattern.permute.xlu0 %v857_v4  ;;  %795 = vset.pattern.permute.xlu1 %v856_v3 }
  0x18   : > { %298 = vperm.xlu0 %793, %v285_v1   ;;  %331 = vperm.xlu1 %795, %v284_v2  }
  0x19   : > { %797 = vset.pattern.permute.xlu2 %v856_v3 }
  0x1a   : > { %327 = vperm.xlu2 %797, %v283_v5  }
  0x20   : > { %379 = vperm.xlu0 %793, %v374_v6   ;;  %798 = vset.pattern.permute.xlu1 %v857_v4 }
  0x21   : > { %389 = vperm.xlu1 %798, %v376_v7  }
  0x22   : > { %799 = vset.pattern.permute.xlu2 %v857_v4 }
  0x23   : > { %384 = vperm.xlu2 %799, %v375_v8  }
  0x29   : > { %434 = vperm.xlu1 %798, %v421_v9  }
  0x2b   : > { %429 = vperm.xlu2 %799, %v420_v10  }
  0x31   : > { %424 = vperm.xlu1 %798, %v419_v11  }
  0x33   : > { %580 = vperm.xlu2 %799, %v577_v12  }
  0x6b   : > { %v289_v13 = vpop.permute.xlu2 %288 }
  0x6c   : > { %v314_v31 = vmul.f32 %v310_v23, %v289_v13  ;;  %v315_v32 = vmul.f32 %v311_v28, %v289_v13  ;;  %v316_v42 = vmul.f32 %v312_v39, %v289_v13  ;;  %v317_v43 = vmul.f32 %v313_v40, %v289_v13 }
  0x74   : > { %v328_v21 = vpop.permute.xlu2 %327 }
  0x75   : > { %v350_v35 = vmul.f32 %v346_v24, %v328_v21  ;;  %v351_v36 = vmul.f32 %v347_v25, %v328_v21  ;;  %v352_v46 = vmul.f32 %v348_v34, %v328_v21  ;;  %v353_v12 = vmul.f32 %v349_v44, %v328_v21 }
  0x77   : > { %v362_v48 = vadd.f32 %v350_v35, %v314_v31  ;;  %v363_v49 = vadd.f32 %v351_v36, %v315_v32  ;;  %v364_v19 = vadd.f32 %v352_v46, %v316_v42  ;;  %v365_v20 = vadd.f32 %v353_v12, %v317_v43  ;;  %v417_v36 = vld [vmem:[%s990_s3 + $0x8] sm:$0xff] }
  0x7d   : > { %v385_v52 = vpop.permute.xlu2 %384 }
  0x81   : > { %v294_v15 = vpop.permute.xlu1 %293  ;;  %v336_v16 = vpop.permute.xlu0 %335 }
  0x82   : > { %v318_v37 = vmul.f32 %v310_v23, %v294_v15  ;;  %v319_v50 = vmul.f32 %v311_v28, %v294_v15  ;;  %v358_v51 = vmul.f32 %v346_v24, %v336_v16  ;;  %v359_v55 = vmul.f32 %v347_v25, %v336_v16 }
  0x83   : > { %v360_v60 = vmul.f32 %v348_v34, %v336_v16  ;;  %v320_v1 = vmul.f32 %v312_v39, %v294_v15  ;;  %v361_v2 = vmul.f32 %v349_v44, %v336_v16  ;;  %v321_v5 = vmul.f32 %v313_v40, %v294_v15 }
  0x8a   : > { %v299_v29 = vpop.permute.xlu0 %298  ;;  %v332_v30 = vpop.permute.xlu1 %331 }
  0x8b   : > { %v354_v38 = vmul.f32 %v346_v24, %v332_v30  ;;  %v322_v45 = vmul.f32 %v310_v23, %v299_v29  ;;  %v323_v47 = vmul.f32 %v311_v28, %v299_v29  ;;  %v324_v53 = vmul.f32 %v312_v39, %v299_v29 }
  0x8c   : > { %v355_v54 = vmul.f32 %v347_v25, %v332_v30  ;;  %v325_v56 = vmul.f32 %v313_v40, %v299_v29  ;;  %v356_v57 = vmul.f32 %v348_v34, %v332_v30  ;;  %v357_v61 = vmul.f32 %v349_v44, %v332_v30  ;;  %v416_v30 = vld [vmem:[%s990_s3] sm:$0xff] }
  0x8d   : > { %v366_v41 = vadd.f32 %v354_v38, %v318_v37  ;;  %v370_v0 = vadd.f32 %v358_v51, %v322_v45  ;;  %v371_v4 = vadd.f32 %v359_v55, %v323_v47  ;;  %v372_v7 = vadd.f32 %v360_v60, %v324_v53  ;;  %v418_v37 = vld [vmem:[%s990_s3 + $0x10] sm:$0xf]  ;;  %v430_v45 = vpop.permute.xlu2 %429 }
  0x8e   : > { %v367_v6 = vadd.f32 %v355_v54, %v319_v50  ;;  %v368_v9 = vadd.f32 %v356_v57, %v320_v1  ;;  %v373_v10 = vadd.f32 %v361_v2, %v325_v56  ;;  %v369_v13 = vadd.f32 %v357_v61, %v321_v5 }
  0x8f   : > { %v396_v59 = vadd.f32 %v385_v52, %v366_v41 }
  0x90   : > { %v397_v18 = vadd.f32 %v385_v52, %v367_v6  ;;  %v398_v16 = vadd.f32 %v385_v52, %v368_v9  ;;  %v399_v15 = vadd.f32 %v385_v52, %v369_v13 }
  0x91   : > { %800 = vtanh.f32 %v396_v59 }
  0x92   : > { %v380_v58 = vpop.permute.xlu0 %379 }
  0x93   : > { %v392_v62 = vadd.f32 %v380_v58, %v362_v48  ;;  %v390_v63 = vpop.permute.xlu1 %389  ;;  %v393_v3 = vadd.f32 %v380_v58, %v363_v49  ;;  %v394_v23 = vadd.f32 %v380_v58, %v364_v19  ;;  %v395_v25 = vadd.f32 %v380_v58, %v365_v20 }
  0x94   : > { %v400_v8 = vadd.f32 %v390_v63, %v370_v0  ;;  %v401_v11 = vadd.f32 %v390_v63, %v371_v4  ;;  %v402_v14 = vadd.f32 %v390_v63, %v372_v7  ;;  %v403_v17 = vadd.f32 %v390_v63, %v373_v10 }
  0x95   : > { %802 = vtanh.f32 %v392_v62 }
  0x96   : > { %804 = vtanh.f32 %v393_v3  ;;  %v576_v3 = vld [vmem:[%s992_s5] sm:$0x1] }
  0x97   : > { %806 = vtanh.f32 %v400_v8  ;;  %v801_v22 = vpop.eup %800 }
  0x98   : > { %808 = vtanh.f32 %v401_v11 }
  0x99   : > { %810 = vtanh.f32 %v402_v14  ;;  %v581_v14 = vpop.permute.xlu2 %580 }
  0x9a   : > { %812 = vtanh.f32 %v403_v17 }
  0x9b   : > { %v803_v24 = vpop.eup %802  ;;  %814 = vtanh.f32 %v397_v18  ;;  %v435_v40 = vpop.permute.xlu1 %434  ;;  %v583_v18 = vperm.slane %v581_v14, 0 }
  0x9c   : > { %v805_v21 = vpop.eup %804  ;;  %816 = vtanh.f32 %v398_v16 }
  0x9d   : > { %v807_v26 = vpop.eup %806  ;;  %818 = vtanh.f32 %v399_v15 }
  0x9e   : > { %v809_v27 = vpop.eup %808  ;;  %820 = vtanh.f32 %v394_v23  ;;  %756 = vmatpush.msk.msra.mxu0 %vm447_vm0, %v807_v26  ;;  %v693_v23 = vlaneseq }
  0x9f   : > { %v811_v28 = vpop.eup %810  ;;  %822 = vtanh.f32 %v395_v25  ;;  %760 = vmatpush.msk.msra.mxu1 %vm447_vm0, %v809_v27 }
  0xa0   : > { %v813_v29 = vpop.eup %812  ;;  %764 = vmatpush.msk.msra.mxu2 %vm447_vm0, %v811_v28  ;;  %474 = vmatpush.msra.mxu0 %v801_v22  ;;  %vm695_vm5 = vcmp.lt.s32.totalorder %v693_v23, 512 }
  0xa1   : > { %v815_v31 = vpop.eup %814  ;;  %768 = vmatpush.msk.msra.mxu3 %vm447_vm0, %v813_v29 }
  0xa2   : > { %v817_v32 = vpop.eup %816  ;;  %500 = vmatpush.msra.mxu1 %v815_v31  ;;  %475 = vmatpush.msra.mxu0 %v803_v24 }
  0xa3   : > { %v819_v33 = vpop.eup %818  ;;  %526 = vmatpush.msra.mxu2 %v817_v32  ;;  %757 = vmatmul.msk.f32.vlgmr.msra.gmra.mxu0 %vm437_vm1, %v416_v30  ;;  %v425_v47 = vpop.permute.xlu1 %424 }
  0xa4   : > { %v821_v34 = vpop.eup %820  ;;  %552 = vmatpush.msra.mxu3 %v819_v33  ;;  %501 = vmatpush.msra.mxu1 %v805_v21 }
  0xa5   : > { %v823_v35 = vpop.eup %822  ;;  %527 = vmatpush.msra.mxu2 %v821_v34  ;;  %761 = vmatmul.msk.f32.vlgmr.msra.gmra.mxu1 %vm437_vm1, %v416_v30 }
  0xa6   : > { %553 = vmatpush.msra.mxu3 %v823_v35  ;;  %765 = vmatmul.msk.f32.vlgmr.msra.gmra.mxu2 %vm437_vm1, %v416_v30 }
  0xa7   : > { %769 = vmatmul.msk.f32.vlgmr.msra.gmra.mxu3 %vm437_vm1, %v416_v30 }
  0xab   : > { %758 = vmatmul.msk.f32.gmra.mxu0 %vm437_vm1, %v417_v36 }
  0xad   : > { %762 = vmatmul.msk.f32.gmra.mxu1 %vm437_vm1, %v417_v36 }
  0xae   : > { %766 = vmatmul.msk.f32.gmra.mxu2 %vm437_vm1, %v417_v36 }
  0xaf   : > { %770 = vmatmul.msk.f32.gmra.mxu3 %vm437_vm1, %v417_v36 }
  0xb3   : > { %759 = vmatmul.msk.f32.gmra.mxu0 %vm437_vm1, %v418_v37 }
  0xb5   : > { %763 = vmatmul.msk.f32.gmra.mxu1 %vm437_vm1, %v418_v37 }
  0xb6   : > { %767 = vmatmul.msk.f32.gmra.mxu2 %vm437_vm1, %v418_v37 }
  0xb7   : > { %771 = vmatmul.msk.f32.gmra.mxu3 %vm437_vm1, %v418_v37 }
 0x120   : > { %v477_v38 = vpop.f32.mrf.mxu0 }
 0x121   : > { %v478_v53 = vadd.f32 %v477_v38, %v425_v47 }
 0x122   : > { %v503_v39 = vpop.f32.mrf.mxu1 }
 0x123   : > { %v504_v56 = vadd.f32 %v503_v39, %v425_v47 }
 0x128   : > { %v480_v41 = vpop.f32.mrf.mxu0 }
 0x129   : > { %v529_v42 = vpop.f32.mrf.mxu2  ;;  %v481_v48 = vadd.f32 %v480_v41, %v430_v45 }
 0x12a   : > { %v555_v43 = vpop.f32.mrf.mxu3  ;;  %v506_v44 = vpop.f32.mrf.mxu1  ;;  %v530_v2 = vadd.f32 %v529_v42, %v425_v47 }
 0x12b   : > { %v507_v55 = vadd.f32 %v506_v44, %v430_v45  ;;  %v556_v5 = vadd.f32 %v555_v43, %v425_v47 }
 0x130   : > { %v483_v46 = vpop.f32.mrf.mxu0 }
 0x131   : > { %v532_v49 = vpop.f32.mrf.mxu2  ;;  %v484_v50 = vadd.f32 %v483_v46, %v435_v40 }
 0x132   : > { %v558_v51 = vpop.f32.mrf.mxu3  ;;  %v509_v52 = vpop.f32.mrf.mxu1  ;;  %v533_v59 = vadd.f32 %v532_v49, %v430_v45 }
 0x133   : > { %824 = vtanh.f32 %v484_v50  ;;  %v510_v54 = vadd.f32 %v509_v52, %v435_v40  ;;  %v559_v63 = vadd.f32 %v558_v51, %v430_v45 }
 0x134   : > { %826 = vtanh.f32 %v481_v48 }
 0x135   : > { %828 = vtanh.f32 %v510_v54 }
 0x136   : > { %830 = vtanh.f32 %v478_v53 }
 0x137   : > { %832 = vtanh.f32 %v507_v55 }
 0x138   : > { %834 = vtanh.f32 %v504_v56 }
 0x139   : > { %v825_v57 = vpop.eup %824  ;;  %v535_v58 = vpop.f32.mrf.mxu2 }
 0x13a   : > { %v536_v60 = vadd.f32 %v535_v58, %v435_v40  ;;  %v561_v61 = vpop.f32.mrf.mxu3  ;;  %772 = vmatpush.msk.msrb.mxu0 %vm447_vm0, %v825_v57  ;;  %v827_v62 = vpop.eup %826 }
 0x13b   : > { %v562_v0 = vadd.f32 %v561_v61, %v435_v40  ;;  %v829_v1 = vpop.eup %828 }
 0x13c   : > { %836 = vtanh.f32 %v536_v60  ;;  %613 = vmatpush.msrb.mxu0 %v827_v62  ;;  %v831_v4 = vpop.eup %830  ;;  %774 = vmatpush.msk.msrb.mxu1 %vm447_vm0, %v829_v1 }
 0x13d   : > { %838 = vtanh.f32 %v562_v0  ;;  %v833_v6 = vpop.eup %832 }
 0x13e   : > { %840 = vtanh.f32 %v533_v59  ;;  %614 = vmatpush.msrb.mxu0 %v831_v4  ;;  %633 = vmatpush.msrb.mxu1 %v833_v6  ;;  %v835_v7 = vpop.eup %834 }
 0x13f   : > { %842 = vtanh.f32 %v559_v63  ;;  %773 = vmatmul.msk.f32.vlgmr.msrb.gmra.mxu0 %vm437_vm1, %v576_v3 }
 0x140   : > { %844 = vtanh.f32 %v530_v2  ;;  %634 = vmatpush.msrb.mxu1 %v835_v7 }
 0x141   : > { %846 = vtanh.f32 %v556_v5  ;;  %775 = vmatmul.msk.f32.vlgmr.msrb.gmra.mxu1 %vm437_vm1, %v576_v3 }
 0x142   : > { %v837_v8 = vpop.eup %836 }
 0x143   : > { %v839_v9 = vpop.eup %838  ;;  %776 = vmatpush.msk.msrb.mxu2 %vm447_vm0, %v837_v8 }
 0x144   : > { %v841_v10 = vpop.eup %840  ;;  %778 = vmatpush.msk.msrb.mxu3 %vm447_vm0, %v839_v9 }
 0x145   : > { %v843_v11 = vpop.eup %842  ;;  %653 = vmatpush.msrb.mxu2 %v841_v10 }
 0x146   : > { %v845_v12 = vpop.eup %844  ;;  %673 = vmatpush.msrb.mxu3 %v843_v11 }
 0x147   : > { %v847_v13 = vpop.eup %846  ;;  %654 = vmatpush.msrb.mxu2 %v845_v12 }
 0x148   : > { %674 = vmatpush.msrb.mxu3 %v847_v13  ;;  %777 = vmatmul.msk.f32.vlgmr.msrb.gmra.mxu2 %vm437_vm1, %v576_v3 }
 0x149   : > { %779 = vmatmul.msk.f32.vlgmr.msrb.gmra.mxu3 %vm437_vm1, %v576_v3 }
 0x1bc   : > { %v616_v20 = vpop.f32.mrf.mxu0 }
 0x1bd   : > { %v617_v26 = vadd.f32 %v616_v20, %v583_v18 }
 0x1be   : > { %v636_v17 = vpop.f32.mrf.mxu1 }
 0x1bf   : > { %v637_v19 = vadd.f32 %v636_v17, %v583_v18 }
 0x1c1   : > { %v683_v24 = vrot.slane %v637_v19, 7 }
 0x1c3   : > { %v687_v28 = vsel %vm686_vm2, %v617_v26, %v683_v24 }
 0x1cb   : > { %v656_v16 = vpop.f32.mrf.mxu2 }
 0x1cc   : > { %v657_v15 = vadd.f32 %v656_v16, %v583_v18  ;;  %v676_v22 = vpop.f32.mrf.mxu3 }
 0x1cd   : > { %v677_v25 = vadd.f32 %v676_v22, %v583_v18 }
 0x1ce   : > { %v684_v21 = vrot.slane %v657_v15, 6 }
 0x1cf   : > { %v685_v27 = vrot.slane %v677_v25, 5 }
 0x1d1   : > { %v689_v29 = vsel %vm688_vm3, %v684_v21, %v685_v27 }
 0x1d2   : > { %v691_v30 = vsel %vm690_vm4, %v687_v28, %v689_v29 }
 0x1d3   : > { %697 = vst.msk [vmem:[%s280_s14] sm:$0xf] %vm695_vm5, %v691_v30 }
 0x1d4 PF: > { %s19_s26 = sadd.s32 1, %s854_s26  }
 0x1d5   : > { %p16_p4 = scmp.ge.s32.totalorder %s19_s26, 6  }
 0x1d7   :  { %18 = sbr.rel (!%p16_p4) target bundleno = 3 (0x3), region = 78 }

</bundles_post_ra>
